<compile_context>
chip_gen: v6e
topology: v6e:2x2x1
jax: 0.10.0
libtpu: 0.0.40
codegen_flags: <defaults>
</compile_context>

<pallas_src>
import numpy as np
import jax
import jax.numpy as jnp
from jax import lax
from jax.experimental import pallas as pl
from jax.experimental.pallas import tpu as pltpu

ALPHA = 0.25
GAMMA = 2.0
EPS = 1e-8


def _round_up(x, m):
    return ((x + m - 1) // m) * m


# ----------------------------------------------------------------------------
# Shared box (L1 + GIoU) and embedding (cosine) cost math for one N-tile.
# Returns  bbox_residual*L1 - w_giou*GIoU - w_embed*<v_n, t>   (all [tn, Tp]).
# ----------------------------------------------------------------------------
def _box_embed_costs(pb, tb, vis, tembT, w_giou, bbox_residual):
    pcx, pcy, pw, ph = pb[:, 0:1], pb[:, 1:2], pb[:, 2:3], pb[:, 3:4]   # [tn,1]
    tcx, tcy, tw, th = tb[0:1, :], tb[1:2, :], tb[2:3, :], tb[3:4, :]   # [1,Tp]

    # L1 bbox cost (boxes are already scaled by w_bbox in the wrapper).
    if bbox_residual == 0.0:
        cost_l1 = 0.0
    else:
        cost_l1 = (jnp.abs(pcx - tcx) + jnp.abs(pcy - tcy)
                   + jnp.abs(pw - tw) + jnp.abs(ph - th))
        if bbox_residual != 1.0:
            cost_l1 = cost_l1 * bbox_residual

    # GIoU (scale-invariant, so the w_bbox folding above does not affect it).
    px0, py0 = pcx - 0.5 * pw, pcy - 0.5 * ph
    px1, py1 = pcx + 0.5 * pw, pcy + 0.5 * ph
    tx0, ty0 = tcx - 0.5 * tw, tcy - 0.5 * th
    tx1, ty1 = tcx + 0.5 * tw, tcy + 0.5 * th
    area_p = (px1 - px0) * (py1 - py0)              # [tn,1]
    area_t = (tx1 - tx0) * (ty1 - ty0)              # [1,Tp]
    iw = jnp.maximum(jnp.minimum(px1, tx1) - jnp.maximum(px0, tx0), 0.0)
    ih = jnp.maximum(jnp.minimum(py1, ty1) - jnp.maximum(py0, ty0), 0.0)
    inter = iw * ih                                 # [tn,Tp]
    union = area_p + area_t - inter
    ew = jnp.maximum(jnp.maximum(px1, tx1) - jnp.minimum(px0, tx0), 0.0)
    eh = jnp.maximum(jnp.maximum(py1, ty1) - jnp.minimum(py0, ty0), 0.0)
    enc = ew * eh
    # divides -> EUP approximate reciprocal (guarded against degenerate boxes)
    inv_union = pl.reciprocal(jnp.maximum(union, 1e-12), approx=True)
    inv_enc = pl.reciprocal(jnp.maximum(enc, 1e-12), approx=True)
    giou = inter * inv_union - (enc - union) * inv_enc

    # Embedding cosine: normalize in f32, bf16 only for the MXU operands.
    # tembT is [E, Tp] (pre-transposed, pre-scaled by w_embed) -> clean [tn,E]x[E,Tp].
    inv_norm = lax.rsqrt(jnp.maximum(jnp.sum(vis * vis, axis=1, keepdims=True),
                                     1e-24))        # == 1/max(||v||, 1e-12)
    vis_n = (vis * inv_norm).astype(jnp.bfloat16)   # [tn, E] bf16
    sim_s = jnp.dot(vis_n, tembT, preferred_element_type=jnp.float32)  # w_embed*<v,t>

    return cost_l1 - w_giou * giou - sim_s


# ----------------------------------------------------------------------------
# Kernel A (primary): one-hot class gather on the MXU (num_classes < T_pad).
# ----------------------------------------------------------------------------
def make_cost_kernel_onehot(w_class, w_giou, w_embed, bbox_residual):
    c_pos = ALPHA * w_class
    c_neg = (1.0 - ALPHA) * w_class

    def kernel(logit_ref, pbox_ref, pemb_ref, onehot_ref, tbox_ref, tembT_ref, c_ref):
        # Focal math on the small [tn, Cn] footprint.
        x = logit_ref[...]                           # [tn, Cn] f32
        prob = jax.nn.sigmoid(x)
        one_m = 1.0 - prob
        pos = c_pos * (one_m * one_m) * (-jnp.log(prob + EPS))
        neg = c_neg * (prob * prob) * (-jnp.log(one_m + EPS))
        d = pos - neg                                # [tn, Cn]  (w_class folded in)
        # Per-target gather as one-hot matmul (exact: single 1.0 per column).
        cost_class = jnp.dot(d, onehot_ref[...],
                             preferred_element_type=jnp.float32)  # [tn, Tp]

        base = _box_embed_costs(pbox_ref[...], tbox_ref[...],
                                pemb_ref[...].astype(jnp.float32),
                                tembT_ref[...], w_giou, bbox_residual)
        # w_embed*(1 - sim) = w_embed - sim_s ; sim_s already inside `base`.
        c_ref[...] = cost_class + base + w_embed

    return kernel


# ----------------------------------------------------------------------------
# Kernel B (fallback): gathered logits [tn, T_pad] (used when Cn >= T_pad).
# Uses -log(1-sigmoid(x)) = x - log(sigmoid(x))  -> one log instead of two.
# ----------------------------------------------------------------------------
def make_cost_kernel_gather(w_class, w_giou, w_embed, bbox_residual):
    c_pos = ALPHA * w_class
    c_neg = (1.0 - ALPHA) * w_class

    def kernel(glog_ref, pbox_ref, pemb_ref, tbox_ref, tembT_ref, c_ref):
        x = glog_ref[...]                            # [tn, Tp] f32 (logit at tgt class)
        prob = jax.nn.sigmoid(x)
        one_m = 1.0 - prob
        lpos = -jnp.log(prob + EPS)
        pos = c_pos * (one_m * one_m) * lpos
        neg = c_neg * (prob * prob) * (x + lpos)     # -log(1-prob) ~= x + lpos
        cost_class = pos - neg

        base = _box_embed_costs(pbox_ref[...], tbox_ref[...],
                                pemb_ref[...].astype(jnp.float32),
                                tembT_ref[...], w_giou, bbox_residual)
        c_ref[...] = cost_class + base + w_embed

    return kernel


# ----------------------------------------------------------------------------
# Tiling / VMEM selection (per-generation aware).
# ----------------------------------------------------------------------------
def _pick_tiling(N, T_pad, Cn_pad, E, tile_n, use_onehot):
    N8 = _round_up(max(N, 8), 8)
    tiles = -(-N8 // max(tile_n, 8))
    if tiles > 1 and tiles % 2 == 1:
        tiles += 1                                    # even tile count -> both v7x TCs busy
    tn = _round_up(-(-N8 // tiles), 8)

    try:
        vmem_cap = int(pltpu.get_tpu_info().vmem_capacity_bytes)
    except Exception:
        vmem_cap = 64 * 1024 * 1024                   # v7x per-TC floor; safe everywhere
    budget = min(vmem_cap * 3 // 4, 100 * 1024 * 1024)

    def need(t):
        out_b = t * T_pad * 4
        in_b = t * 4 * 4 + t * E * 4 + 4 * T_pad * 4 + E * T_pad * 2
        if use_onehot:
            in_b += t * Cn_pad * 4 + Cn_pad * T_pad * 4
        else:
            in_b += t * T_pad * 4
        live = 12 * t * T_pad * 4                     # f32 GIoU/focal/combine temporaries
        return 2 * (out_b + in_b) + live + (2 << 20)

    while need(tn) > budget and tn > 8:
        tn = _round_up(max(tn // 2, 8), 8)
    N_pad = _round_up(N8, tn)
    vmem_limit = min(vmem_cap, max(need(tn), 32 * 1024 * 1024))
    return tn, N_pad, int(vmem_limit)


# ----------------------------------------------------------------------------
# Wrapper: builds operands, calls pallas_call, returns the PADDED cost matrix
# [N_pad, T_pad] (slice/reshape happens on host, per perf review).
# ----------------------------------------------------------------------------
def compute_cost_matrix(pred_logits, pred_boxes, pred_embed,
                        tgt_ids, tgt_bbox, text_embeddings,
                        cost_class=1.0, cost_bbox=1.0, cost_giou=1.0,
                        cost_embed=0.5, tile_n=512, class_path="auto"):
    bs, nq, Cn = pred_logits.shape
    N = bs * nq
    T = int(tgt_ids.shape[0])
    E = int(pred_embed.shape[-1])
    tgt_ids = tgt_ids.astype(jnp.int32)

    T_pad = max(128, _round_up(max(T, 1), 128))       # lane-dense [*, T] tiles
    Cn_pad = _round_up(Cn, 8)

    if class_path == "auto":
        use_onehot = Cn_pad < T_pad
    else:
        use_onehot = (class_path == "onehot")

    tn, N_pad, vmem_limit = _pick_tiling(N, T_pad, Cn_pad, E, tile_n, use_onehot)

    # ---- fold w_bbox into box coordinates (GIoU is scale-invariant) ---------
    box_scale = float(cost_bbox) if cost_bbox > 0 else 1.0
    bbox_residual = float(cost_bbox) / box_scale      # 1.0 (folded) or e.g. 0.0

    boxes_flat = pred_boxes.reshape(N, 4).astype(jnp.float32) * box_scale
    pad_box = jnp.tile(jnp.asarray([[0.5, 0.5, 1.0, 1.0]], jnp.float32) * box_scale,
                       (N_pad - N, 1))
    boxes_flat = jnp.concatenate([boxes_flat, pad_box], axis=0)      # [N_pad, 4]

    tb = tgt_bbox.astype(jnp.float32).T * box_scale                  # [4, T]
    pad_tb = jnp.tile(jnp.asarray([[0.5], [0.5], [1.0], [1.0]], jnp.float32) * box_scale,
                      (1, T_pad - T))
    tb = jnp.concatenate([tb, pad_tb], axis=1)                       # [4, T_pad]

    # ---- embeddings: pred stays f32 (normalized in-kernel); text pre-gathered,
    #      pre-transposed to [E, T_pad], w_embed folded in, cast to bf16 -------
    embed_flat = jnp.pad(pred_embed.reshape(N, E).astype(jnp.float32),
                         ((0, N_pad - N), (0, 0)))                   # [N_pad, E] f32
    txt_g = jnp.take(text_embeddings.astype(jnp.float32), tgt_ids, axis=0)   # [T, E]
    txt_gT = jnp.pad(txt_g.T * float(cost_embed),
                     ((0, 0), (0, T_pad - T))).astype(jnp.bfloat16)  # [E, T_pad] bf16

    common_tail_specs = [
        pl.BlockSpec((4, T_pad), lambda i: (0, 0)),    # target boxes (resident)
        pl.BlockSpec((E, T_pad), lambda i: (0, 0)),    # text emb^T (resident, bf16)
    ]

    if use_onehot:
        logits_flat = jnp.pad(pred_logits.reshape(N, Cn).astype(jnp.float32),
                              ((0, N_pad - N), (0, Cn_pad - Cn)))    # [N_pad, Cn_pad]
        ids_pad = jnp.pad(tgt_ids, (0, T_pad - T), constant_values=-1)
        onehot = (jnp.arange(Cn_pad, dtype=jnp.int32)[:, None]
                  == ids_pad[None, :]).astype(jnp.float32)           # [Cn_pad, T_pad]
        kernel = make_cost_kernel_onehot(cost_class, cost_giou, cost_embed,
                                         bbox_residual)
        in_specs = [
            pl.BlockSpec((tn, Cn_pad), lambda i: (i, 0)),  # logits (per-tile)
            pl.BlockSpec((tn, 4), lambda i: (i, 0)),       # pred boxes
            pl.BlockSpec((tn, E), lambda i: (i, 0)),       # pred embeds (f32)
            pl.BlockSpec((Cn_pad, T_pad), lambda i: (0, 0)),  # one-hot (resident)
        ] + common_tail_specs
        operands = (logits_flat, boxes_flat, embed_flat, onehot, tb, txt_gT)
        in_bytes = 4 * N_pad * Cn_pad + 4 * Cn_pad * T_pad
        class_trans = 3 * N_pad * Cn_pad
        class_flops = 2 * N_pad * T_pad * Cn_pad
    else:
        # TODO(synk): for v5e keep this stream in bf16 (upcast after load) when
        # the gathered path dominates HBM traffic.
        glog = jnp.take(pred_logits.reshape(N, Cn).astype(jnp.float32),
                        tgt_ids, axis=1)                             # [N, T]
        glog = jnp.pad(glog, ((0, N_pad - N), (0, T_pad - T)))       # [N_pad, T_pad]
        kernel = make_cost_kernel_gather(cost_class, cost_giou, cost_embed,
                                         bbox_residual)
        in_specs = [
            pl.BlockSpec((tn, T_pad), lambda i: (i, 0)),   # gathered logits
            pl.BlockSpec((tn, 4), lambda i: (i, 0)),
            pl.BlockSpec((tn, E), lambda i: (i, 0)),
        ] + common_tail_specs
        operands = (glog, boxes_flat, embed_flat, tb, txt_gT)
        in_bytes = 4 * N_pad * T_pad
        class_trans = 2 * N_pad * T_pad
        class_flops = 0

    cost_est = pl.CostEstimate(
        flops=int(2 * N_pad * T_pad * E + class_flops + 40 * N_pad * T_pad),
        transcendentals=int(2 * N_pad * T_pad + class_trans + N_pad),
        bytes_accessed=int(4 * N_pad * T_pad + in_bytes + 4 * N_pad * 4
                           + 4 * N_pad * E + 4 * 4 * T_pad + 2 * E * T_pad),
    )

    grid = (N_pad // tn,)
    C_pad = pl.pallas_call(
        kernel,
        out_shape=jax.ShapeDtypeStruct((N_pad, T_pad), jnp.float32),
        grid=grid,
        in_specs=in_specs,
        out_specs=pl.BlockSpec((tn, T_pad), lambda i: (i, 0)),
        compiler_params=pltpu.CompilerParams(
            dimension_semantics=("parallel",),
            vmem_limit_bytes=vmem_limit),
        cost_estimate=cost_est,
    )(*operands)

    return C_pad     # padded; host slices to [:N, :T]


# ----------------------------------------------------------------------------
# Host-side Hungarian assignment (shortest augmenting path, O(n^2 m)).
# TODO(synk): linear_sum_assignment is inherently sequential; no clean Pallas
#             equivalent, so it runs on host in NumPy (matches scipy semantics).
# ----------------------------------------------------------------------------
def linear_sum_assignment_np(cost):
    cost = np.asarray(cost, dtype=np.float64)
    transposed = False
    n, m = cost.shape
    if n > m:
        cost = cost.T
        n, m = cost.shape
        transposed = True
    INF = float("inf")
    u = np.zeros(n + 1)
    v = np.zeros(m + 1)
    p = np.zeros(m + 1, dtype=np.int64)
    way = np.zeros(m + 1, dtype=np.int64)
    for i in range(1, n + 1):
        p[0] = i
        j0 = 0
        minv = np.full(m + 1, INF)
        used = np.zeros(m + 1, dtype=bool)
        while True:
            used[j0] = True
            i0 = p[j0]
            delta = INF
            j1 = -1
            for j in range(1, m + 1):
                if not used[j]:
                    cur = cost[i0 - 1, j - 1] - u[i0] - v[j]
                    if cur < minv[j]:
                        minv[j] = cur
                        way[j] = j0
                    if minv[j] < delta:
                        delta = minv[j]
                        j1 = j
            for j in range(m + 1):
                if used[j]:
                    u[p[j]] += delta
                    v[j] -= delta
                else:
                    minv[j] -= delta
            j0 = j1
            if p[j0] == 0:
                break
        while True:
            j1 = way[j0]
            p[j0] = p[j1]
            j0 = j1
            if j0 == 0:
                break
    ans = np.full(n, -1, dtype=np.int64)
    for j in range(1, m + 1):
        if p[j] != 0:
            ans[p[j] - 1] = j - 1
    rows = np.arange(n, dtype=np.int64)
    cols = ans
    if transposed:
        rows, cols = cols, rows
        order = np.argsort(rows)
        rows, cols = rows[order], cols[order]
    return rows, cols


def hungarian_matcher_forward(outputs, targets, text_embeddings,
                              cost_class=1.0, cost_bbox=1.0, cost_giou=1.0,
                              cost_embed=0.5):
    """Mirrors HungarianMatcher.forward. Returns (indices, C_np[bs,nq,T])."""
    bs, nq = outputs["pred_logits"].shape[:2]
    sizes = [int(t["boxes"].shape[0]) for t in targets]
    T = sum(sizes)
    if T == 0:
        empty = np.zeros((0,), np.int64)
        return [(empty, empty) for _ in targets], np.zeros((bs, nq, 0), np.float32)

    tgt_ids = jnp.concatenate([t["labels"] for t in targets]).astype(jnp.int32)
    tgt_bbox = jnp.concatenate([t["boxes"] for t in targets], axis=0)
    C_pad = compute_cost_matrix(outputs["pred_logits"], outputs["pred_boxes"],
                                outputs["pred_embed"], tgt_ids, tgt_bbox,
                                text_embeddings, cost_class, cost_bbox,
                                cost_giou, cost_embed)
    C_pad = jax.block_until_ready(C_pad)
    # Padded [N_pad, T_pad] -> [bs, nq, T] entirely on host (no extra HBM pass).
    C_np = np.asarray(C_pad)[: bs * nq, :T].reshape(bs, nq, T)

    indices = []
    start = 0
    for i, s in enumerate(sizes):
        if s == 0:
            indices.append((np.zeros((0,), np.int64), np.zeros((0,), np.int64)))
            continue
        r, c = linear_sum_assignment_np(C_np[i, :, start:start + s])
        indices.append((r.astype(np.int64), c.astype(np.int64)))
        start += s
    return indices, C_np


# ----------------------------------------------------------------------------
# Pure NumPy reference (same math as the PyTorch module) for verification
# ----------------------------------------------------------------------------
def reference_cost(pred_logits, pred_boxes, pred_embed, tgt_ids, tgt_bbox,
                   text_emb, wc, wb, wg, we):
    bs, nq, Cn = pred_logits.shape
    N = bs * nq
    logits = np.asarray(pred_logits, np.float64).reshape(N, Cn)
    out_bbox = np.asarray(pred_boxes, np.float64).reshape(N, 4)
    vis = np.asarray(pred_embed, np.float64).reshape(N, -1)
    tgt_ids = np.asarray(tgt_ids)
    tgt_bbox = np.asarray(tgt_bbox, np.float64)
    text_emb = np.asarray(text_emb, np.float64)

    prob = 1.0 / (1.0 + np.exp(-logits))
    neg = (1 - ALPHA) * prob ** GAMMA * -np.log(1 - prob + EPS)
    pos = ALPHA * (1 - prob) ** GAMMA * -np.log(prob + EPS)
    cost_class = pos[:, tgt_ids] - neg[:, tgt_ids]
    cost_bbox = np.abs(out_bbox[:, None, :] - tgt_bbox[None, :, :]).sum(-1)

    def to_xyxy(b):
        cx, cy, w, h = b[:, 0], b[:, 1], b[:, 2], b[:, 3]
        return np.stack([cx - 0.5 * w, cy - 0.5 * h, cx + 0.5 * w, cy + 0.5 * h], -1)

    b1, b2 = to_xyxy(out_bbox), to_xyxy(tgt_bbox)
    a1 = (b1[:, 2] - b1[:, 0]) * (b1[:, 3] - b1[:, 1])
    a2 = (b2[:, 2] - b2[:, 0]) * (b2[:, 3] - b2[:, 1])
    lt = np.maximum(b1[:, None, :2], b2[None, :, :2])
    rb = np.minimum(b1[:, None, 2:], b2[None, :, 2:])
    wh = np.clip(rb - lt, 0, None)
    inter = wh[..., 0] * wh[..., 1]
    union = a1[:, None] + a2[None, :] - inter
    iou = inter / union
    elt = np.minimum(b1[:, None, :2], b2[None, :, :2])
    erb = np.maximum(b1[:, None, 2:], b2[None, :, 2:])
    ewh = np.clip(erb - elt, 0, None)
    enc = ewh[..., 0] * ewh[..., 1]
    giou = iou - (enc - union) / enc
    cost_giou = -giou

    vn = vis / np.maximum(np.linalg.norm(vis, axis=1, keepdims=True), 1e-12)
    cost_embed = 1.0 - vn @ text_emb[tgt_ids].T

    C = wb * cost_bbox + wc * cost_class + wg * cost_giou + we * cost_embed
    return C.reshape(bs, nq, -1)


# ----------------------------------------------------------------------------
if __name__ == "__main__":
    key = jax.random.PRNGKey(0)
    bs, num_queries, num_classes, embed_dim = 2, 16, 8, 32
    sizes = [3, 5]                                   # targets per batch element

    ks = jax.random.split(key, 8)
    pred_logits = jax.random.normal(ks[0], (bs, num_queries, num_classes), jnp.float32)
    cxcy = jax.random.uniform(ks[1], (bs, num_queries, 2), minval=0.2, maxval=0.8)
    wh = jax.random.uniform(ks[2], (bs, num_queries, 2), minval=0.05, maxval=0.3)
    pred_boxes = jnp.concatenate([cxcy, wh], axis=-1)
    pred_embed = jax.random.normal(ks[3], (bs, num_queries, embed_dim), jnp.float32)
    text_embeddings = jax.random.normal(ks[4], (num_classes, embed_dim), jnp.float32)

    targets = []
    for i, s in enumerate(sizes):
        kl, kb1, kb2 = jax.random.split(ks[5 + i], 3)
        labels = jax.random.randint(kl, (s,), 0, num_classes, jnp.int32)
        tcxcy = jax.random.uniform(kb1, (s, 2), minval=0.2, maxval=0.8)
        twh = jax.random.uniform(kb2, (s, 2), minval=0.05, maxval=0.3)
        targets.append({"labels": labels, "boxes": jnp.concatenate([tcxcy, twh], -1)})

    outputs = {"pred_logits": pred_logits, "pred_boxes": pred_boxes,
               "pred_embed": pred_embed}

    WC, WB, WG, WE = 1.0, 1.0, 1.0, 0.5
    indices, C_np = hungarian_matcher_forward(outputs, targets, text_embeddings,
                                              cost_class=WC, cost_bbox=WB,
                                              cost_giou=WG, cost_embed=WE)

    # Reference (f64) of the torch math.  Tolerance covers bf16 MXU operands on
    # the embedding path and the EUP approximate reciprocal in GIoU.
    tgt_ids_np = np.concatenate([np.asarray(t["labels"]) for t in targets])
    tgt_bbox_np = np.concatenate([np.asarray(t["boxes"]) for t in targets], 0)
    C_ref = reference_cost(pred_logits, pred_boxes, pred_embed, tgt_ids_np,
                           tgt_bbox_np, text_embeddings, WC, WB, WG, WE)
    assert np.allclose(C_np, C_ref, rtol=2e-3, atol=2e-2), \
        np.max(np.abs(C_np - C_ref))

    # Also exercise the gathered-logit fallback path (used when Cn >= T_pad).
    N, T = bs * num_queries, sum(sizes)
    tgt_ids_j = jnp.asarray(tgt_ids_np, jnp.int32)
    tgt_bbox_j = jnp.asarray(tgt_bbox_np, jnp.float32)
    C_pad_g = compute_cost_matrix(pred_logits, pred_boxes, pred_embed,
                                  tgt_ids_j, tgt_bbox_j, text_embeddings,
                                  WC, WB, WG, WE, class_path="gather")
    C_pad_g = jax.block_until_ready(C_pad_g)
    Cg = np.asarray(C_pad_g)[:N, :T].reshape(bs, num_queries, T)
    assert np.allclose(Cg, C_ref, rtol=2e-3, atol=2e-2), \
        np.max(np.abs(Cg - C_ref))

    # sanity: one (pred, target) pair per target box, per batch element
    for (ri, ci), s in zip(indices, sizes):
        assert len(ri) == len(ci) == min(num_queries, s)

    print("KERNEL_OK")
</pallas_src>

<mosaic_0001>
module attributes {stable_mosaic.version = 11 : i64} {
  func.func @kernel(%arg0: i32, %arg1: memref<32x8xf32, #tpu.memory_space<vmem>>, %arg2: memref<32x4xf32, #tpu.memory_space<vmem>>, %arg3: memref<32x32xf32, #tpu.memory_space<vmem>>, %arg4: memref<8x128xf32, #tpu.memory_space<vmem>>, %arg5: memref<4x128xf32, #tpu.memory_space<vmem>>, %arg6: memref<32x128xbf16, #tpu.memory_space<vmem>>, %arg7: memref<32x128xf32, #tpu.memory_space<vmem>>) attributes {dimension_semantics = [#tpu.dimension_semantics<parallel>], iteration_bounds = array<i64: 1>, scalar_prefetch = 0 : i64, scratch_operands = 0 : i64, tpu.core_type = #tpu.core_type<tc>, window_params = [{transform_indices = @transform_0, window_bounds = array<i64: 32, 8>}, {transform_indices = @transform_1, window_bounds = array<i64: 32, 4>}, {transform_indices = @transform_2, window_bounds = array<i64: 32, 32>}, {pipeline_mode = #tpu.pipeline_mode<synchronous>, transform_indices = @transform_3, window_bounds = array<i64: 8, 128>}, {pipeline_mode = #tpu.pipeline_mode<synchronous>, transform_indices = @transform_4, window_bounds = array<i64: 4, 128>}, {pipeline_mode = #tpu.pipeline_mode<synchronous>, transform_indices = @transform_5, window_bounds = array<i64: 32, 128>}, {transform_indices = @transform_6, window_bounds = array<i64: 32, 128>}]} {
    %c0 = arith.constant 0 : index
    %c0_0 = arith.constant 0 : index
    %0 = vector.load %arg1[%c0, %c0_0] : memref<32x8xf32, #tpu.memory_space<vmem>>, vector<32x8xf32>
    %1 = arith.negf %0 : vector<32x8xf32>
    %2 = math.exp %1 : vector<32x8xf32>
    %cst = arith.constant 1.000000e+00 : f32
    %3 = vector.broadcast %cst : f32 to vector<32x8xf32>
    %4 = arith.addf %3, %2 : vector<32x8xf32>
    %5 = arith.divf %3, %4 : vector<32x8xf32>
    %cst_1 = arith.constant 1.000000e+00 : f32
    %6 = vector.broadcast %cst_1 : f32 to vector<32x8xf32>
    %7 = arith.subf %6, %5 : vector<32x8xf32>
    %8 = arith.mulf %7, %7 : vector<32x8xf32>
    %cst_2 = arith.constant 2.500000e-01 : f32
    %9 = vector.broadcast %cst_2 : f32 to vector<32x8xf32>
    %10 = arith.mulf %9, %8 : vector<32x8xf32>
    %cst_3 = arith.constant 9.99999993E-9 : f32
    %11 = vector.broadcast %cst_3 : f32 to vector<32x8xf32>
    %12 = arith.addf %5, %11 : vector<32x8xf32>
    %13 = math.log %12 : vector<32x8xf32>
    %cst_4 = arith.constant 0.000000e+00 : f32
    %14 = vector.broadcast %cst_4 : f32 to vector<32x8xf32>
    %15 = arith.subf %14, %13 : vector<32x8xf32>
    %16 = arith.mulf %10, %15 : vector<32x8xf32>
    %17 = arith.mulf %5, %5 : vector<32x8xf32>
    %cst_5 = arith.constant 7.500000e-01 : f32
    %18 = vector.broadcast %cst_5 : f32 to vector<32x8xf32>
    %19 = arith.mulf %18, %17 : vector<32x8xf32>
    %cst_6 = arith.constant 9.99999993E-9 : f32
    %20 = vector.broadcast %cst_6 : f32 to vector<32x8xf32>
    %21 = arith.addf %7, %20 : vector<32x8xf32>
    %22 = math.log %21 : vector<32x8xf32>
    %cst_7 = arith.constant 0.000000e+00 : f32
    %23 = vector.broadcast %cst_7 : f32 to vector<32x8xf32>
    %24 = arith.subf %23, %22 : vector<32x8xf32>
    %25 = arith.mulf %19, %24 : vector<32x8xf32>
    %26 = arith.subf %16, %25 : vector<32x8xf32>
    %c0_8 = arith.constant 0 : index
    %c0_9 = arith.constant 0 : index
    %27 = vector.load %arg4[%c0_8, %c0_9] : memref<8x128xf32, #tpu.memory_space<vmem>>, vector<8x128xf32>
    %cst_10 = arith.constant dense<0.000000e+00> : vector<32x128xf32>
    %28 = tpu.matmul %26, %27, %cst_10 {dimension_numbers = #tpu.dot_dimension_numbers<[1], [0], [0], [1], [0, 0, 1, 1], [], []>} : vector<32x8xf32>, vector<8x128xf32>, vector<32x128xf32> -> vector<32x128xf32>
    %c0_11 = arith.constant 0 : index
    %c0_12 = arith.constant 0 : index
    %29 = vector.load %arg2[%c0_11, %c0_12] : memref<32x4xf32, #tpu.memory_space<vmem>>, vector<32x4xf32>
    %c0_13 = arith.constant 0 : index
    %c0_14 = arith.constant 0 : index
    %30 = vector.load %arg5[%c0_13, %c0_14] : memref<4x128xf32, #tpu.memory_space<vmem>>, vector<4x128xf32>
    %c0_15 = arith.constant 0 : index
    %c0_16 = arith.constant 0 : index
    %31 = vector.load %arg3[%c0_15, %c0_16] : memref<32x32xf32, #tpu.memory_space<vmem>>, vector<32x32xf32>
    %c0_17 = arith.constant 0 : index
    %c0_18 = arith.constant 0 : index
    %32 = vector.load %arg6[%c0_17, %c0_18] : memref<32x128xbf16, #tpu.memory_space<vmem>>, vector<32x128xbf16>
    %33 = vector.extract_strided_slice %29 {offsets = [0, 0], sizes = [32, 1], strides = [1, 1]} : vector<32x4xf32> to vector<32x1xf32>
    %34 = vector.extract_strided_slice %29 {offsets = [0, 1], sizes = [32, 1], strides = [1, 1]} : vector<32x4xf32> to vector<32x1xf32>
    %35 = vector.extract_strided_slice %29 {offsets = [0, 2], sizes = [32, 1], strides = [1, 1]} : vector<32x4xf32> to vector<32x1xf32>
    %36 = vector.extract_strided_slice %29 {offsets = [0, 3], sizes = [32, 1], strides = [1, 1]} : vector<32x4xf32> to vector<32x1xf32>
    %37 = vector.extract_strided_slice %30 {offsets = [0, 0], sizes = [1, 128], strides = [1, 1]} : vector<4x128xf32> to vector<1x128xf32>
    %38 = vector.extract_strided_slice %30 {offsets = [1, 0], sizes = [1, 128], strides = [1, 1]} : vector<4x128xf32> to vector<1x128xf32>
    %39 = vector.extract_strided_slice %30 {offsets = [2, 0], sizes = [1, 128], strides = [1, 1]} : vector<4x128xf32> to vector<1x128xf32>
    %40 = vector.extract_strided_slice %30 {offsets = [3, 0], sizes = [1, 128], strides = [1, 1]} : vector<4x128xf32> to vector<1x128xf32>
    %41 = vector.broadcast %33 : vector<32x1xf32> to vector<32x128xf32>
    %42 = vector.broadcast %37 : vector<1x128xf32> to vector<32x128xf32>
    %43 = arith.subf %41, %42 : vector<32x128xf32>
    %44 = math.absf %43 : vector<32x128xf32>
    %45 = vector.broadcast %34 : vector<32x1xf32> to vector<32x128xf32>
    %46 = vector.broadcast %38 : vector<1x128xf32> to vector<32x128xf32>
    %47 = arith.subf %45, %46 : vector<32x128xf32>
    %48 = math.absf %47 : vector<32x128xf32>
    %49 = arith.addf %44, %48 : vector<32x128xf32>
    %50 = vector.broadcast %35 : vector<32x1xf32> to vector<32x128xf32>
    %51 = vector.broadcast %39 : vector<1x128xf32> to vector<32x128xf32>
    %52 = arith.subf %50, %51 : vector<32x128xf32>
    %53 = math.absf %52 : vector<32x128xf32>
    %54 = arith.addf %49, %53 : vector<32x128xf32>
    %55 = vector.broadcast %36 : vector<32x1xf32> to vector<32x128xf32>
    %56 = vector.broadcast %40 : vector<1x128xf32> to vector<32x128xf32>
    %57 = arith.subf %55, %56 : vector<32x128xf32>
    %58 = math.absf %57 : vector<32x128xf32>
    %59 = arith.addf %54, %58 : vector<32x128xf32>
    %cst_19 = arith.constant 5.000000e-01 : f32
    %60 = vector.broadcast %cst_19 : f32 to vector<32x1xf32>
    %61 = arith.mulf %60, %35 : vector<32x1xf32>
    %62 = arith.subf %33, %61 : vector<32x1xf32>
    %cst_20 = arith.constant 5.000000e-01 : f32
    %63 = vector.broadcast %cst_20 : f32 to vector<32x1xf32>
    %64 = arith.mulf %63, %36 : vector<32x1xf32>
    %65 = arith.subf %34, %64 : vector<32x1xf32>
    %cst_21 = arith.constant 5.000000e-01 : f32
    %66 = vector.broadcast %cst_21 : f32 to vector<32x1xf32>
    %67 = arith.mulf %66, %35 : vector<32x1xf32>
    %68 = arith.addf %33, %67 : vector<32x1xf32>
    %cst_22 = arith.constant 5.000000e-01 : f32
    %69 = vector.broadcast %cst_22 : f32 to vector<32x1xf32>
    %70 = arith.mulf %69, %36 : vector<32x1xf32>
    %71 = arith.addf %34, %70 : vector<32x1xf32>
    %cst_23 = arith.constant 5.000000e-01 : f32
    %72 = vector.broadcast %cst_23 : f32 to vector<1x128xf32>
    %73 = arith.mulf %72, %39 : vector<1x128xf32>
    %74 = arith.subf %37, %73 : vector<1x128xf32>
    %cst_24 = arith.constant 5.000000e-01 : f32
    %75 = vector.broadcast %cst_24 : f32 to vector<1x128xf32>
    %76 = arith.mulf %75, %40 : vector<1x128xf32>
    %77 = arith.subf %38, %76 : vector<1x128xf32>
    %cst_25 = arith.constant 5.000000e-01 : f32
    %78 = vector.broadcast %cst_25 : f32 to vector<1x128xf32>
    %79 = arith.mulf %78, %39 : vector<1x128xf32>
    %80 = arith.addf %37, %79 : vector<1x128xf32>
    %cst_26 = arith.constant 5.000000e-01 : f32
    %81 = vector.broadcast %cst_26 : f32 to vector<1x128xf32>
    %82 = arith.mulf %81, %40 : vector<1x128xf32>
    %83 = arith.addf %38, %82 : vector<1x128xf32>
    %84 = arith.subf %68, %62 : vector<32x1xf32>
    %85 = arith.subf %71, %65 : vector<32x1xf32>
    %86 = arith.mulf %84, %85 : vector<32x1xf32>
    %87 = arith.subf %80, %74 : vector<1x128xf32>
    %88 = arith.subf %83, %77 : vector<1x128xf32>
    %89 = arith.mulf %87, %88 : vector<1x128xf32>
    %90 = vector.broadcast %68 : vector<32x1xf32> to vector<32x128xf32>
    %91 = vector.broadcast %80 : vector<1x128xf32> to vector<32x128xf32>
    %92 = arith.minimumf %90, %91 : vector<32x128xf32>
    %93 = vector.broadcast %62 : vector<32x1xf32> to vector<32x128xf32>
    %94 = vector.broadcast %74 : vector<1x128xf32> to vector<32x128xf32>
    %95 = arith.maximumf %93, %94 : vector<32x128xf32>
    %96 = arith.subf %92, %95 : vector<32x128xf32>
    %cst_27 = arith.constant 0.000000e+00 : f32
    %97 = vector.broadcast %cst_27 : f32 to vector<32x128xf32>
    %98 = arith.maximumf %96, %97 : vector<32x128xf32>
    %99 = vector.broadcast %71 : vector<32x1xf32> to vector<32x128xf32>
    %100 = vector.broadcast %83 : vector<1x128xf32> to vector<32x128xf32>
    %101 = arith.minimumf %99, %100 : vector<32x128xf32>
    %102 = vector.broadcast %65 : vector<32x1xf32> to vector<32x128xf32>
    %103 = vector.broadcast %77 : vector<1x128xf32> to vector<32x128xf32>
    %104 = arith.maximumf %102, %103 : vector<32x128xf32>
    %105 = arith.subf %101, %104 : vector<32x128xf32>
    %cst_28 = arith.constant 0.000000e+00 : f32
    %106 = vector.broadcast %cst_28 : f32 to vector<32x128xf32>
    %107 = arith.maximumf %105, %106 : vector<32x128xf32>
    %108 = arith.mulf %98, %107 : vector<32x128xf32>
    %109 = vector.broadcast %86 : vector<32x1xf32> to vector<32x128xf32>
    %110 = vector.broadcast %89 : vector<1x128xf32> to vector<32x128xf32>
    %111 = arith.addf %109, %110 : vector<32x128xf32>
    %112 = arith.subf %111, %108 : vector<32x128xf32>
    %113 = vector.broadcast %68 : vector<32x1xf32> to vector<32x128xf32>
    %114 = vector.broadcast %80 : vector<1x128xf32> to vector<32x128xf32>
    %115 = arith.maximumf %113, %114 : vector<32x128xf32>
    %116 = vector.broadcast %62 : vector<32x1xf32> to vector<32x128xf32>
    %117 = vector.broadcast %74 : vector<1x128xf32> to vector<32x128xf32>
    %118 = arith.minimumf %116, %117 : vector<32x128xf32>
    %119 = arith.subf %115, %118 : vector<32x128xf32>
    %cst_29 = arith.constant 0.000000e+00 : f32
    %120 = vector.broadcast %cst_29 : f32 to vector<32x128xf32>
    %121 = arith.maximumf %119, %120 : vector<32x128xf32>
    %122 = vector.broadcast %71 : vector<32x1xf32> to vector<32x128xf32>
    %123 = vector.broadcast %83 : vector<1x128xf32> to vector<32x128xf32>
    %124 = arith.maximumf %122, %123 : vector<32x128xf32>
    %125 = vector.broadcast %65 : vector<32x1xf32> to vector<32x128xf32>
    %126 = vector.broadcast %77 : vector<1x128xf32> to vector<32x128xf32>
    %127 = arith.minimumf %125, %126 : vector<32x128xf32>
    %128 = arith.subf %124, %127 : vector<32x128xf32>
    %cst_30 = arith.constant 0.000000e+00 : f32
    %129 = vector.broadcast %cst_30 : f32 to vector<32x128xf32>
    %130 = arith.maximumf %128, %129 : vector<32x128xf32>
    %131 = arith.mulf %121, %130 : vector<32x128xf32>
    %cst_31 = arith.constant 9.99999996E-13 : f32
    %132 = vector.broadcast %cst_31 : f32 to vector<32x128xf32>
    %133 = arith.maximumf %112, %132 : vector<32x128xf32>
    %134 = tpu.reciprocal %133 {approx = true} : vector<32x128xf32> -> vector<32x128xf32>
    %cst_32 = arith.constant 9.99999996E-13 : f32
    %135 = vector.broadcast %cst_32 : f32 to vector<32x128xf32>
    %136 = arith.maximumf %131, %135 : vector<32x128xf32>
    %137 = tpu.reciprocal %136 {approx = true} : vector<32x128xf32> -> vector<32x128xf32>
    %138 = arith.mulf %108, %134 : vector<32x128xf32>
    %139 = arith.subf %131, %112 : vector<32x128xf32>
    %140 = arith.mulf %139, %137 : vector<32x128xf32>
    %141 = arith.subf %138, %140 : vector<32x128xf32>
    %142 = arith.mulf %31, %31 : vector<32x32xf32>
    %cst_33 = arith.constant dense<0.000000e+00> : vector<32xf32>
    %143 = vector.multi_reduction <add>, %142, %cst_33 [1] : vector<32x32xf32> to vector<32xf32>
    %144 = vector.shape_cast %143 : vector<32xf32> to vector<32x1xf32>
    %cst_34 = arith.constant 1.000000e-24 : f32
    %145 = vector.broadcast %cst_34 : f32 to vector<32x1xf32>
    %146 = arith.maximumf %144, %145 : vector<32x1xf32>
    %147 = math.rsqrt %146 : vector<32x1xf32>
    %148 = vector.broadcast %147 : vector<32x1xf32> to vector<32x32xf32>
    %149 = arith.mulf %31, %148 : vector<32x32xf32>
    %150 = arith.truncf %149 : vector<32x32xf32> to vector<32x32xbf16>
    %cst_35 = arith.constant dense<0.000000e+00> : vector<32x128xf32>
    %151 = tpu.matmul %150, %32, %cst_35 {dimension_numbers = #tpu.dot_dimension_numbers<[1], [0], [0], [1], [0, 0, 1, 1], [], []>} : vector<32x32xbf16>, vector<32x128xbf16>, vector<32x128xf32> -> vector<32x128xf32>
    %cst_36 = arith.constant 1.000000e+00 : f32
    %152 = vector.broadcast %cst_36 : f32 to vector<32x128xf32>
    %153 = arith.mulf %152, %141 : vector<32x128xf32>
    %154 = arith.subf %59, %153 : vector<32x128xf32>
    %155 = arith.subf %154, %151 : vector<32x128xf32>
    %156 = arith.addf %28, %155 : vector<32x128xf32>
    %cst_37 = arith.constant 5.000000e-01 : f32
    %157 = vector.broadcast %cst_37 : f32 to vector<32x128xf32>
    %158 = arith.addf %156, %157 : vector<32x128xf32>
    %c0_38 = arith.constant 0 : index
    %c0_39 = arith.constant 0 : index
    %159 = vector.load %arg7[%c0_38, %c0_39] : memref<32x128xf32, #tpu.memory_space<vmem>>, vector<32x128xf32>
    tpu.vector_store %arg7[%c0_38, %c0_39], %158 {strides = array<i32>} : memref<32x128xf32, #tpu.memory_space<vmem>>, vector<32x128xf32>,
    return
  }
  func.func @transform_0(%arg0: i32) -> (i32, i32) {
    %c0_i32 = arith.constant 0 : i32
    %c0_i32_0 = arith.constant 0 : i32
    return %arg0, %c0_i32 : i32, i32
  }
  func.func @transform_1(%arg0: i32) -> (i32, i32) {
    %c0_i32 = arith.constant 0 : i32
    %c0_i32_0 = arith.constant 0 : i32
    return %arg0, %c0_i32 : i32, i32
  }
  func.func @transform_2(%arg0: i32) -> (i32, i32) {
    %c0_i32 = arith.constant 0 : i32
    %c0_i32_0 = arith.constant 0 : i32
    return %arg0, %c0_i32 : i32, i32
  }
  func.func @transform_3(%arg0: i32) -> (i32, i32) {
    %c0_i32 = arith.constant 0 : i32
    %c0_i32_0 = arith.constant 0 : i32
    %c0_i32_1 = arith.constant 0 : i32
    return %c0_i32, %c0_i32_0 : i32, i32
  }
  func.func @transform_4(%arg0: i32) -> (i32, i32) {
    %c0_i32 = arith.constant 0 : i32
    %c0_i32_0 = arith.constant 0 : i32
    %c0_i32_1 = arith.constant 0 : i32
    return %c0_i32, %c0_i32_0 : i32, i32
  }
  func.func @transform_5(%arg0: i32) -> (i32, i32) {
    %c0_i32 = arith.constant 0 : i32
    %c0_i32_0 = arith.constant 0 : i32
    %c0_i32_1 = arith.constant 0 : i32
    return %c0_i32, %c0_i32_0 : i32, i32
  }
  func.func @transform_6(%arg0: i32) -> (i32, i32) {
    %c0_i32 = arith.constant 0 : i32
    %c0_i32_0 = arith.constant 0 : i32
    return %arg0, %c0_i32 : i32, i32
  }
}

</mosaic_0001>

<bundles_post_ra>
// kernel: tpu_custom_call.1
= control target key start
LH: loop header
LB: loop body
LE: loop exit
PB: predicated region body
PF: predicated region fallthrough
CT: control target
= control target key end

     0   :  { %vm550_vm0 = vcmask 261120   ;;  %v913_v7 = vmov 0   ;;  %s1273_s0 = inlined_call_operand.vmem [shape: f32[32,8], index: 0, kind: input, shape index: {}]   ;;  %s1274_s1 = inlined_call_operand.vmem [shape: f32[32,4], index: 1, kind: input, shape index: {}]   ;;  %s1275_s2 = inlined_call_operand.vmem [shape: f32[32,32], index: 2, kind: input, shape index: {}]   ;;  %s1276_s3 = inlined_call_operand.vmem [shape: f32[8,128], index: 3, kind: input, shape index: {}]   ;;  %s1277_s4 = inlined_call_operand.vmem [shape: f32[4,128], index: 4, kind: input, shape index: {}]   ;;  %s1278_s5 = inlined_call_operand.vmem [shape: bf16[32,128], index: 5, kind: input, shape index: {}]   ;;  %s1279_s6 = inlined_call_operand.hbm [shape: f32[32,128], index: 6, kind: output, shape index: {}]  }
   0x1   :  { %v960_v0 = vld [vmem:[%s1275_s2 + $0x10] sm:$0xff]  ;;  %v965_v1 = vld [vmem:[%s1275_s2] sm:$0xff]  ;;  %v970_v2 = vld [vmem:[%s1275_s2 + $0x18] sm:$0xff]  ;;  %820 = vset.pattern.permute.xlu1 %v913_v7 }
   0x2   :  { %v548_v3 = vmul.f32 %v960_v0, %v960_v0  ;;  %v546_v4 = vmul.f32 %v965_v1, %v965_v1  ;;  %v549_v5 = vmul.f32 %v970_v2, %v970_v2  ;;  %v981_v6 = vld [vmem:[%s1275_s2 + $0x8] sm:$0xff] }
   0x3   :  { %v547_v8 = vmul.f32 %v981_v6, %v981_v6 }
   0x4   :  { %v557_v9 = vsel %vm550_vm0, %v548_v3, 0.0  ;;  %v551_v10 = vsel %vm550_vm0, %v546_v4, 0.0  ;;  %v560_v11 = vsel %vm550_vm0, %v549_v5, 0.0 }
   0x5   :  { %558 = vadd.xlane.f32.xlu1 %v557_v9  ;;  %552 = vadd.xlane.f32.xlu0 %v551_v10  ;;  %v554_v12 = vsel %vm550_vm0, %v547_v8, 0.0 }
   0x6   :  { %11 = vsyncpa [#allocation3], 0  ;;  %v993_v13 = vld [vmem:[%s1274_s1 + $0x8] sm:$0xff]  ;;  %v999_v15 = vld [vmem:[%s1274_s1 + $0x10] sm:$0xff]  ;;  %s914_s10 = smov 126   ;;  %v915_v22 = vmov 2  }
   0x7   :  { %v260_v14 = vmul.f32 0.5, %v993_v13  ;;  %v1004_v16 = vld [vmem:[%s1274_s1] sm:$0xff]  ;;  %v261_v17 = vmul.f32 0.5, %v999_v15  ;;  %v1011_v19 = vld [vmem:[%s1274_s1 + $0x18] sm:$0xff]  ;;  %v833_v21 = vld [vmem:[%s1278_s5 + $0x8] sm:$0xff]   ;;  %822 = vset.pattern.permute.xlu0 %v915_v22  ;;  %v916_v28 = vmov 1  }
   0x8   :  { %v259_v18 = vmul.f32 0.5, %v1004_v16  ;;  %v262_v20 = vmul.f32 0.5, %v1011_v19  ;;  %795 = vmatprep.subr.bf16.mxu0 %v833_v21  ;;  %v834_v23 = vld [vmem:[%s1278_s5] sm:$0xff]   ;;  %v26_v26 = vld [vmem:[%s1273_s0 + $0x8] sm:$0xff]  ;;  %v27_v29 = vld [vmem:[%s1273_s0 + $0x10] sm:$0xff]  ;;  %vm652_vm1 = vcmask 64512  }
   0x9   :  { %561 = vadd.xlane.f32.xlu1 %v560_v11  ;;  %555 = vadd.xlane.f32.xlu0 %v554_v12  ;;  %v25_v24 = vld [vmem:[%s1273_s0] sm:$0xff]  ;;  %v775_v27 = vmul.f32 -1.442695, %v26_v26  ;;  %v776_v30 = vmul.f32 -1.442695, %v27_v29  ;;  %v28_v31 = vld [vmem:[%s1273_s0 + $0x18] sm:$0xff] }
   0xa   :  { %796 = vmatpush3.bf16.msra.mxu0 %v833_v21  ;;  %v774_v25 = vmul.f32 -1.442695, %v25_v24  ;;  %v777_v32 = vmul.f32 -1.442695, %v28_v31  ;;  %v117_v56 = vld [vmem:[%s1276_s3] sm:$0xff]  ;;  %s917_s3 = smov 127  }
   0xb   :  { %797 = vmatprep.subr.bf16.mxu0 %v834_v23  ;;  %803 = vmatprep.subr.mxu1 %v117_v56 }
   0xc   :  { %835 = vpow2.f32 %v774_v25  ;;  %804 = vmatpush3.msra.mxu1 %v117_v56 }
   0xd   :  { %837 = vpow2.f32 %v775_v27 }
   0xe   :  { %798 = vmatpush3.bf16.msra.mxu0 %v834_v23  ;;  %839 = vpow2.f32 %v776_v30 }
   0xf   :  { %841 = vpow2.f32 %v777_v32 }
  0x19   :  { %v836_v33 = vpop.eup %835 }
  0x1a   :  { %269 = vrot.lane.b32.xlu1 %v260_v14, %s914_s10  ;;  %v838_v34 = vpop.eup %837  ;;  %v41_v35 = vadd.f32 1.0, %v836_v33 }
  0x1b   :  { %v42_v36 = vadd.f32 1.0, %v838_v34  ;;  %v840_v37 = vpop.eup %839 }
  0x1c   :  { %843 = vrcp.f32 %v41_v35  ;;  %v842_v38 = vpop.eup %841  ;;  %v43_v39 = vadd.f32 1.0, %v840_v37 }
  0x1d   :  { %845 = vrcp.f32 %v42_v36  ;;  %v44_v40 = vadd.f32 1.0, %v842_v38 }
  0x1e   :  { %271 = vrot.lane.b32.xlu1 %v261_v17, %s914_s10  ;;  %847 = vrcp.f32 %v43_v39 }
  0x1f   :  { %267 = vrot.lane.b32.xlu0 %v259_v18, %s914_s10  ;;  %849 = vrcp.f32 %v44_v40 }
  0x22   :  { %273 = vrot.lane.b32.xlu1 %v262_v20, %s914_s10 }
  0x26   :  { %138 = vperm.xlu1 %820, %v993_v13  }
  0x29   :  { %v844_v41 = vpop.eup %843 }
  0x2a   :  { %143 = vperm.xlu1 %820, %v999_v15   ;;  %v846_v42 = vpop.eup %845  ;;  %v53_v43 = vsub.f32 1.0, %v844_v41  ;;  %v65_v45 = vadd.f32 1e-08, %v844_v41  ;;  %v85_v59 = vmul.f32 %v844_v41, %v844_v41 }
  0x2b   :  { %v54_v44 = vsub.f32 1.0, %v846_v42  ;;  %v848_v47 = vpop.eup %847  ;;  %v66_v48 = vadd.f32 1e-08, %v846_v42  ;;  %v86_v62 = vmul.f32 %v846_v42, %v846_v42 }
  0x2c   :  { %v93_v46 = vadd.f32 1e-08, %v53_v43  ;;  %v850_v50 = vpop.eup %849  ;;  %851 = vlog2.f32 %v65_v45  ;;  %v55_v51 = vsub.f32 1.0, %v848_v47  ;;  %v67_v52 = vadd.f32 1e-08, %v848_v47 }
  0x2d   :  { %v94_v49 = vadd.f32 1e-08, %v54_v44  ;;  %v56_v54 = vsub.f32 1.0, %v850_v50  ;;  %v68_v55 = vadd.f32 1e-08, %v850_v50  ;;  %v57_v58 = vmul.f32 %v53_v43, %v53_v43 }
  0x2e   :  { %821 = vset.pattern.permute.xlu1 %v916_v28  ;;  %853 = vlog2.f32 %v93_v46  ;;  %v95_v53 = vadd.f32 1e-08, %v55_v51  ;;  %v58_v60 = vmul.f32 %v54_v44, %v54_v44  ;;  %v59_v5 = vmul.f32 %v55_v51, %v55_v51 }
  0x2f   :  { %164 = vperm.xlu1 %821, %v1004_v16   ;;  %855 = vlog2.f32 %v66_v48  ;;  %v96_v57 = vadd.f32 1e-08, %v56_v54  ;;  %v61_v3 = vmul.f32 0.25, %v57_v58  ;;  %v89_v9 = vmul.f32 0.75, %v85_v59 }
  0x30   :  { %857 = vlog2.f32 %v94_v49  ;;  %v87_v11 = vmul.f32 %v848_v47, %v848_v47  ;;  %v62_v17 = vmul.f32 0.25, %v58_v60  ;;  %v90_v23 = vmul.f32 0.75, %v86_v62 }
  0x31   :  { %859 = vlog2.f32 %v67_v52  ;;  %v60_v25 = vmul.f32 %v56_v54, %v56_v54  ;;  %v63_v30 = vmul.f32 0.25, %v59_v5  ;;  %v88_v43 = vmul.f32 %v850_v50, %v850_v50 }
  0x32   :  { %861 = vlog2.f32 %v95_v53  ;;  %v91_v35 = vmul.f32 0.75, %v87_v11 }
  0x33   :  { %172 = vperm.xlu1 %821, %v999_v15   ;;  %863 = vlog2.f32 %v68_v55  ;;  %v64_v47 = vmul.f32 0.25, %v60_v25  ;;  %v92_v52 = vmul.f32 0.75, %v88_v43 }
  0x34   :  { %865 = vlog2.f32 %v96_v57 }
  0x39   :  { %v852_v61 = vpop.eup %851 }
  0x3a   :  { %v70_v4 = vmul.f32 0.6931472, %v852_v61 }
  0x3b   :  { %v854_v63 = vpop.eup %853 }
  0x3c   :  { %v856_v8 = vpop.eup %855  ;;  %v98_v10 = vmul.f32 0.6931472, %v854_v63  ;;  %v77_v14 = vsub.f32 0.0, %v70_v4 }
  0x3d   :  { %v858_v12 = vpop.eup %857  ;;  %v72_v18 = vmul.f32 0.6931472, %v856_v8 }
  0x3e   :  { %v860_v20 = vpop.eup %859  ;;  %v105_v21 = vsub.f32 0.0, %v98_v10  ;;  %v100_v24 = vmul.f32 0.6931472, %v858_v12  ;;  %v81_v27 = vmul.f32 %v77_v14, %v61_v3 }
  0x3f   :  { %v862_v26 = vpop.eup %861  ;;  %v78_v29 = vsub.f32 0.0, %v72_v18  ;;  %v74_v31 = vmul.f32 0.6931472, %v860_v20 }
  0x40   :  { %v864_v32 = vpop.eup %863  ;;  %v109_v33 = vmul.f32 %v105_v21, %v89_v9  ;;  %v106_v34 = vsub.f32 0.0, %v100_v24  ;;  %v102_v36 = vmul.f32 0.6931472, %v862_v26 }
  0x41   :  { %v82_v37 = vmul.f32 %v78_v29, %v62_v17  ;;  %v79_v38 = vsub.f32 0.0, %v74_v31  ;;  %v76_v39 = vmul.f32 0.6931472, %v864_v32  ;;  %v866_v49 = vpop.eup %865 }
  0x42   :  { %v113_v40 = vsub.f32 %v81_v27, %v109_v33  ;;  %v110_v41 = vmul.f32 %v106_v34, %v90_v23  ;;  %v107_v42 = vsub.f32 0.0, %v102_v36  ;;  %v104_v53 = vmul.f32 0.6931472, %v866_v49 }
  0x43   :  { %v83_v44 = vmul.f32 %v79_v38, %v63_v30  ;;  %v80_v48 = vsub.f32 0.0, %v76_v39 }
  0x44   :  { %805 = vmatprep.mubr.msk.f32.mxu1 %vm652_vm1, %v113_v40  ;;  %v114_v45 = vsub.f32 %v82_v37, %v110_v41  ;;  %v111_v46 = vmul.f32 %v107_v42, %v91_v35  ;;  %v108_v55 = vsub.f32 0.0, %v104_v53  ;;  %v918_v42 = vmov 3  }
  0x45   :  { %v84_v54 = vmul.f32 %v80_v48, %v64_v47 }
  0x46   :  { %806 = vmatmul.mubr.msk.f32.vlgmr.msra.gmra.mxu1 %vm652_vm1, %v114_v45  ;;  %v115_v51 = vsub.f32 %v83_v44, %v111_v46  ;;  %v112_v56 = vmul.f32 %v108_v55, %v92_v52  ;;  %v151_v45 = vlaneseq }
  0x48   :  { %808 = vmatprep.mubr.msk.f32.mxu1 %vm652_vm1, %v115_v51  ;;  %v116_v57 = vsub.f32 %v84_v54, %v112_v56  ;;  %v1096_v47 = vshrl.u32 %v151_v45, 7 }
  0x4a   :  { %809 = vmatmul.mubr.msk.f32.gmra.mxu1 %vm652_vm1, %v116_v57  ;;  %v181_v49 = vsub.s32 1, %v1096_v47 }
  0x8e   :  { %v559_v50 = vpop.xlane.xlu1 %558  ;;  %v553_v58 = vpop.xlane.xlu0 %552 }
  0x8f   :  { %v565_v59 = vmax.f32 %v559_v50, 1e-24  ;;  %v563_v60 = vmax.f32 %v553_v58, 1e-24 }
  0x91   :  { %867 = vrsqrt.f32 %v565_v59 }
  0x92   :  { %v562_v61 = vpop.xlane.xlu1 %561  ;;  %v556_v62 = vpop.xlane.xlu0 %555  ;;  %869 = vrsqrt.f32 %v563_v60 }
  0x93   :  { %v566_v63 = vmax.f32 %v562_v61, 1e-24  ;;  %v564_v3 = vmax.f32 %v556_v62, 1e-24 }
  0x95   :  { %871 = vrsqrt.f32 %v566_v63 }
  0x96   :  { %873 = vrsqrt.f32 %v564_v3  ;;  %v270_v4 = vpop.permute.xlu1 %269  ;;  %v268_v5 = vpop.permute.xlu0 %267 }
  0x97   :  { %v280_v8 = vsub.f32 %v993_v13, %v270_v4  ;;  %v284_v9 = vadd.f32 %v270_v4, %v993_v13  ;;  %v279_v10 = vsub.f32 %v1004_v16, %v268_v5  ;;  %v283_v11 = vadd.f32 %v268_v5, %v1004_v16 }
  0x99   :  { %v1049_v12 = vsub.f32 %v284_v9, %v280_v8  ;;  %v1051_v14 = vsub.f32 %v283_v11, %v279_v10 }
  0x9a   :  { %v272_v17 = vpop.permute.xlu1 %271 }
  0x9b   :  { %v281_v18 = vsub.f32 %v999_v15, %v272_v17  ;;  %v285_v20 = vadd.f32 %v272_v17, %v999_v15  ;;  %303 = vrot.lane.b32.xlu1 %v1049_v12, %s917_s3  ;;  %301 = vrot.lane.b32.xlu0 %v1051_v14, %s917_s3 }
  0x9d   :  { %v295_v21 = vsub.f32 %v285_v20, %v281_v18 }
  0x9e   :  { %v274_v23 = vpop.permute.xlu1 %273  ;;  %v868_v26 = vpop.eup %867 }
  0x9f   :  { %v282_v24 = vsub.f32 %v1011_v19, %v274_v23  ;;  %v286_v25 = vadd.f32 %v274_v23, %v1011_v19  ;;  %305 = vrot.lane.b32.xlu0 %v295_v21, %s917_s3  ;;  %v870_v27 = vpop.eup %869  ;;  %v573_v32 = vmul.f32 %v868_v26, %v960_v0 }
  0xa0   :  { %v571_v34 = vmul.f32 %v870_v27, %v965_v1 }
  0xa1   :  { %v296_v29 = vsub.f32 %v286_v25, %v282_v24 }
  0xa2   :  { %v872_v30 = vpop.eup %871  ;;  %v1080_v0 = vpop.permute.xlu1 %138 }
  0xa3   :  { %v874_v31 = vpop.eup %873  ;;  %307 = vrot.lane.b32.xlu1 %v296_v29, %s917_s3  ;;  %196 = vperm.xlu0 %822, %v1004_v16   ;;  %v574_v33 = vmul.f32 %v872_v30, %v970_v2 }
  0xa4   :  { %v572_v35 = vmul.f32 %v874_v31, %v981_v6 }
  0xa5   :  { %v576_v36 = vpack.c.bf16 %v574_v33, %v573_v32 }
  0xa6   :  { %v575_v37 = vpack.c.bf16 %v572_v35, %v571_v34  ;;  %v1082_v1 = vpop.permute.xlu1 %143 }
  0xa7   :  { %176 = vperm.xlu1 %821, %v1011_v19   ;;  %208 = vperm.xlu0 %822, %v1011_v19  }
  0xa8   :  { %799 = vmatprep.mubr.msk.bf16.mxu0 %vm550_vm0, %v575_v37 }
  0xa9   :  { %800 = vmatmul.mubr.msk.bf16.vlgmr.msra.gmra.mxu0 %vm550_vm0, %v576_v36 }
  0xaa   :  { %v1084_v2 = vpop.permute.xlu1 %164 }
  0xab   :  { %823 = vset.pattern.permute.xlu1 %v915_v22  ;;  %824 = vset.pattern.permute.xlu0 %v913_v7 }
  0xac   :  { %200 = vperm.xlu1 %823, %v993_v13   ;;  %133 = vperm.xlu0 %824, %v1004_v16  }
  0xae   :  { %v1086_v6 = vpop.permute.xlu1 %172 }
  0xb0   :  { %204 = vperm.xlu1 %823, %v999_v15   ;;  %148 = vperm.xlu0 %824, %v1011_v19  }
  0xb4   :  { %825 = vset.pattern.permute.xlu1 %v913_v7  ;;  %329 = vperm.xlu0 %824, %v284_v9  }
  0xb5   :  { %324 = vperm.xlu1 %825, %v283_v11  }
  0xb8   :  { %352 = vperm.xlu0 %824, %v279_v10  }
  0xb9   :  { %334 = vperm.xlu1 %825, %v285_v20  }
  0xbc   :  { %362 = vperm.xlu0 %824, %v281_v18  }
  0xbd   :  { %339 = vperm.xlu1 %825, %v286_v25  }
  0xc0   :  { %826 = vset.pattern.permute.xlu0 %v916_v28 }
  0xc1   :  { %357 = vperm.xlu1 %825, %v280_v8   ;;  %168 = vperm.xlu0 %826, %v993_v13  }
  0xc5   :  { %367 = vperm.xlu1 %825, %v282_v24   ;;  %387 = vperm.xlu0 %826, %v283_v11  }
  0xc9   :  { %827 = vset.pattern.permute.xlu1 %v916_v28  ;;  %399 = vperm.xlu0 %826, %v286_v25  }
  0xca   :  { %391 = vperm.xlu1 %827, %v284_v9  }
  0xcd   :  { %415 = vperm.xlu0 %826, %v280_v8  }
  0xce   :  { %395 = vperm.xlu1 %827, %v285_v20  }
  0xd1   :  { %423 = vperm.xlu0 %826, %v282_v24  }
  0xd2   :  { %411 = vperm.xlu1 %827, %v279_v10  }
  0xd5   :  { %829 = vset.pattern.permute.xlu0 %v913_v7 }
  0xd6   :  { %419 = vperm.xlu1 %827, %v281_v18  }
  0xda   :  { %828 = vset.pattern.permute.xlu1 %v913_v7 }
 0x10d   :  { %v304_v22 = vpop.permute.xlu1 %303  ;;  %v302_v28 = vpop.permute.xlu0 %301 }
 0x10e   :  { %v314_v38 = vmul.f32 %v304_v22, %v1049_v12  ;;  %v313_v39 = vmul.f32 %v302_v28, %v1051_v14 }
 0x110   :  { %453 = vperm.xlu0 %829, %v314_v38   ;;  %448 = vperm.xlu1 %828, %v313_v39  }
 0x111   :  { %v306_v40 = vpop.permute.xlu0 %305 }
 0x112   :  { %v315_v41 = vmul.f32 %v306_v40, %v295_v21 }
 0x114   :  { %830 = vset.pattern.permute.xlu0 %v918_v42  ;;  %458 = vperm.xlu1 %828, %v315_v41  }
 0x115   :  { %v308_v43 = vpop.permute.xlu1 %307  ;;  %228 = vperm.xlu0 %830, %v1004_v16   ;;  %v213_v16 = vsub.s32 2, %v1096_v47 }
 0x116   :  { %v316_v44 = vmul.f32 %v308_v43, %v296_v29 }
 0x118   :  { %463 = vperm.xlu1 %828, %v316_v44  }
 0x119   :  { %240 = vperm.xlu0 %830, %v1011_v19   ;;  %v1104_v19 = vld [vmem:[%s1277_s4] sm:$0xf]  ;;  %s919_s4 = smov [#allocation2]  }
 0x11a   :  { %v1110_v52 = vrot.slane %v1104_v19, %v181_v49  ;;  %v287_v17 = vmul.f32 0.5, %v1104_v19  ;;  %s763_s26 = sshll.u32 %s919_s4, 4  ;;  %s764_s26 = int_to_ptr.vmem [resolvable:$true] %s763_s26 }
 0x11b   :  { %s891_s27 = scalar_lea.vmem %s764_s26, 512  ;;  %p896_p1 = scmp.lt.s32.totalorder %s764_s26, %s764_s26 }
 0x11c   :  { %831 = vset.pattern.permute.xlu1 %v918_v42  ;;  %v289_v18 = vrot.slane %v287_v17, 2  ;;  %p892_p0 = scmp.ne.s32.totalorder %s764_s26, %s891_s27  ;;  %p897_p2 = scmp.lt.s32.totalorder %s891_s27, %s891_s27 }
 0x11d   :  { %232 = vperm.xlu1 %831, %v993_v13   ;;  %832 = vset.pattern.permute.xlu0 %v913_v7  ;;  %v153_v13 = vsub.s32 0, %v1096_v47 }
 0x11e   :  { %v1094_v46 = vpop.permute.xlu0 %196  ;;  %v292_v23 = vadd.f32 %v289_v18, %v1104_v19  ;;  %v291_v24 = vsub.f32 %v1104_v19, %v289_v18  ;;  %p898_p3 = por %p897_p2, %p896_p1 }
 0x11f   :  { %v1116_v53 = vrot.slane %v1104_v19, %v153_v13 }
 0x120   :  { %v317_v25 = vsub.f32 %v292_v23, %v291_v24  ;;  %v1144_v30 = vrot.slane %v291_v24, %v153_v13  ;;  %v1146_v31 = vrot.slane %v291_v24, %v181_v49  ;;  %v1148_v32 = vrot.slane %v292_v23, %v153_v13  ;;  %p899_p4 = pnand %p898_p3, %p892_p0 }
 0x121   :  { %236 = vperm.xlu1 %831, %v999_v15   ;;  %v1113_v15 = vrot.slane %v1104_v19, %v213_v16  ;;  %v405_v22 = vrot.slane %v292_v23, %v181_v49 }
 0x122   :  { %v209_v48 = vpop.permute.xlu0 %208  ;;  %v177_v51 = vpop.permute.xlu1 %176  ;;  %v319_v29 = vrot.slane %v317_v25, 1 }
 0x123   :  { %v186_v54 = vsub.f32 %v177_v51, %v1110_v52  ;;  %v218_v55 = vsub.f32 %v209_v48, %v1113_v15 }
 0x124   :  { %v321_v35 = vmul.f32 %v319_v29, %v317_v25 }
 0x125   :  { %v190_v50 = vand.u32 2147483647, %v186_v54  ;;  %v222_v58 = vand.u32 2147483647, %v218_v55 }
 0x126   :  { %v1157_v43 = vrot.slane %v321_v35, %v153_v13 }
 0x127   :  { %v1107_v7 = vpop.permute.xlu0 %133  ;;  %v1123_v62 = vpop.permute.xlu1 %200 }
 0x12b   :  { %v149_v56 = vpop.permute.xlu0 %148  ;;  %v1125_v63 = vpop.permute.xlu1 %204 }
 0x12c   :  { %v158_v57 = vsub.f32 %v149_v56, %v1116_v53 }
 0x12e   :  { %v162_v59 = vand.u32 2147483647, %v158_v57 }
 0x12f   :  { %v330_v4 = vpop.permute.xlu0 %329 }
 0x130   :  { %v194_v60 = vadd.f32 %v190_v50, %v162_v59  ;;  %v325_v3 = vpop.permute.xlu1 %324  ;;  %v479_v49 = vmax.f32 %v330_v4, %v1148_v32  ;;  %v347_v57 = vmin.f32 %v330_v4, %v1148_v32 }
 0x131   :  { %v346_v38 = vmin.f32 %v325_v3, %v1148_v32  ;;  %v478_v39 = vmax.f32 %v325_v3, %v1148_v32 }
 0x132   :  { %v1121_v61 = vadd.f32 %v222_v58, %v194_v60 }
 0x133   :  { %v353_v8 = vpop.permute.xlu0 %352 }
 0x134   :  { %v1127_v5 = vpop.permute.xlu1 %334  ;;  %v374_v36 = vmax.f32 %v353_v8, %v1144_v30  ;;  %v482_v37 = vmin.f32 %v353_v8, %v1144_v30 }
 0x135   :  { %v348_v50 = vmin.f32 %v1127_v5, %v1148_v32  ;;  %v480_v23 = vmax.f32 %v1127_v5, %v1148_v32 }
 0x136   :  { %v378_v44 = vsub.f32 %v346_v38, %v374_v36  ;;  %v486_v45 = vsub.f32 %v478_v39, %v482_v37 }
 0x137   :  { %v1131_v10 = vpop.permute.xlu0 %362 }
 0x138   :  { %v1129_v9 = vpop.permute.xlu1 %339  ;;  %v484_v59 = vmin.f32 %v1131_v10, %v1144_v30  ;;  %v382_v18 = vmax.f32 %v378_v44, 0.0 }
 0x13a   :  { %v488_v36 = vsub.f32 %v480_v23, %v484_v59 }
 0x13c   :  { %v358_v11 = vpop.permute.xlu1 %357  ;;  %v1133_v12 = vpop.permute.xlu0 %168 }
 0x13d   :  { %v483_v41 = vmin.f32 %v358_v11, %v1144_v30  ;;  %v375_v54 = vmax.f32 %v358_v11, %v1144_v30  ;;  %v490_v11 = vmax.f32 %v486_v45, 0.0 }
 0x13f   :  { %v487_v60 = vsub.f32 %v479_v49, %v483_v41  ;;  %v379_v4 = vsub.f32 %v347_v57, %v375_v54 }
 0x140   :  { %v1135_v14 = vpop.permute.xlu1 %367  ;;  %v388_v20 = vpop.permute.xlu0 %387 }
 0x141   :  { %v494_v48 = vmax.f32 %v388_v20, %v405_v22  ;;  %v406_v3 = vmin.f32 %v388_v20, %v405_v22  ;;  %v491_v37 = vmax.f32 %v487_v60, 0.0 }
 0x144   :  { %v1140_v26 = vpop.permute.xlu0 %399 }
 0x145   :  { %v392_v21 = vpop.permute.xlu1 %391  ;;  %v497_v38 = vmax.f32 %v1140_v26, %v405_v22 }
 0x146   :  { %v495_v42 = vmax.f32 %v392_v21, %v405_v22  ;;  %v407_v13 = vmin.f32 %v392_v21, %v405_v22 }
 0x148   :  { %v416_v33 = vpop.permute.xlu0 %415 }
 0x149   :  { %v1142_v27 = vpop.permute.xlu1 %395  ;;  %v499_v28 = vmin.f32 %v416_v33, %v1146_v31  ;;  %v431_v16 = vmax.f32 %v416_v33, %v1146_v31  ;;  %v376_v33 = vmax.f32 %v1131_v10, %v1144_v30  ;;  %v481_v10 = vmax.f32 %v1129_v9, %v1148_v32 }
 0x14a   :  { %v496_v29 = vmax.f32 %v1142_v27, %v405_v22 }
 0x14b   :  { %v503_v55 = vsub.f32 %v495_v42, %v499_v28  ;;  %v435_v24 = vsub.f32 %v407_v13, %v431_v16  ;;  %v485_v28 = vmin.f32 %v1135_v14, %v1144_v30  ;;  %v383_v42 = vmax.f32 %v379_v4, 0.0 }
 0x14c   :  { %v424_v8 = vpop.permute.xlu0 %423  ;;  %v380_v54 = vsub.f32 %v348_v50, %v376_v33 }
 0x14d   :  { %v412_v34 = vpop.permute.xlu1 %411  ;;  %v507_v25 = vmax.f32 %v503_v55, 0.0  ;;  %v439_v39 = vmax.f32 %v435_v24, 0.0  ;;  %v433_v41 = vmax.f32 %v424_v8, %v1146_v31  ;;  %v349_v55 = vmin.f32 %v1129_v9, %v1148_v32 }
 0x14e   :  { %v498_v40 = vmin.f32 %v412_v34, %v1146_v31  ;;  %v430_v56 = vmax.f32 %v412_v34, %v1146_v31  ;;  %v501_v34 = vmin.f32 %v424_v8, %v1146_v31  ;;  %v489_v57 = vsub.f32 %v481_v10, %v485_v28 }
 0x14f   :  { %v1183_v44 = vmul.f32 %v507_v25, %v491_v37  ;;  %v1192_v59 = vmul.f32 %v439_v39, %v383_v42  ;;  %v384_v23 = vmax.f32 %v380_v54, 0.0 }
 0x150   :  { %v502_v58 = vsub.f32 %v494_v48, %v498_v40  ;;  %v434_v21 = vsub.f32 %v406_v3, %v430_v56  ;;  %v408_v40 = vmin.f32 %v1142_v27, %v405_v22  ;;  %v409_v48 = vmin.f32 %v1140_v26, %v405_v22 }
 0x151   :  { %v420_v51 = vpop.permute.xlu1 %419  ;;  %v505_v16 = vsub.f32 %v497_v38, %v501_v34  ;;  %v377_v27 = vmax.f32 %v1135_v14, %v1144_v30  ;;  %v492_v56 = vmax.f32 %v488_v36, 0.0  ;;  %v523_v26 = vmax.f32 %v1183_v44, 1e-12 }
 0x152   :  { %v500_v17 = vmin.f32 %v420_v51, %v1146_v31  ;;  %v506_v20 = vmax.f32 %v502_v58, 0.0  ;;  %v432_v35 = vmax.f32 %v420_v51, %v1146_v31  ;;  %v438_v45 = vmax.f32 %v434_v21, 0.0 }
 0x153   :  { %v437_v13 = vsub.f32 %v409_v48, %v433_v41  ;;  %v509_v9 = vmax.f32 %v505_v16, 0.0  ;;  %v381_v30 = vsub.f32 %v349_v55, %v377_v27  ;;  %875 = vrcp.f32 %v523_v26 }
 0x154   :  { %v504_v5 = vsub.f32 %v496_v29, %v500_v17  ;;  %v1186_v51 = vmul.f32 %v506_v20, %v490_v11  ;;  %v436_v49 = vsub.f32 %v408_v40, %v432_v35  ;;  %v1195_v22 = vmul.f32 %v438_v45, %v382_v18 }
 0x155   :  { %v493_v18 = vmax.f32 %v489_v57, 0.0  ;;  %v441_v4 = vmax.f32 %v437_v13, 0.0  ;;  %v385_v20 = vmax.f32 %v381_v30, 0.0  ;;  %v245_v36 = vsub.s32 3, %v1096_v47 }
 0x156   :  { %v508_v31 = vmax.f32 %v504_v5, 0.0  ;;  %v522_v32 = vmax.f32 %v1186_v51, 1e-12  ;;  %v440_v14 = vmax.f32 %v436_v49, 0.0  ;;  %v155_v5 = vsub.f32 %v1107_v7, %v1116_v53 }
 0x157   :  { %v1210_v21 = vmul.f32 %v509_v9, %v493_v18  ;;  %v1222_v38 = vmul.f32 %v441_v4, %v385_v20  ;;  %v184_v40 = vsub.f32 %v1133_v12, %v1110_v52  ;;  %v183_v47 = vsub.f32 %v1084_v2, %v1110_v52 }
 0x158   :  { %v1200_v8 = vmul.f32 %v508_v31, %v492_v56  ;;  %877 = vrcp.f32 %v522_v32  ;;  %v1212_v33 = vmul.f32 %v440_v14, %v384_v23  ;;  %v1232_v42 = vrot.slane %v1104_v19, %v245_v36 }
 0x159   :  { %v525_v41 = vmax.f32 %v1210_v21, 1e-12  ;;  %v215_v12 = vsub.f32 %v1094_v46, %v1113_v15  ;;  %v159_v48 = vand.u32 2147483647, %v155_v5  ;;  %v216_v2 = vsub.f32 %v1123_v62, %v1113_v15 }
 0x15a   :  { %v524_v35 = vmax.f32 %v1200_v8, 1e-12  ;;  %v188_v19 = vand.u32 2147483647, %v184_v40  ;;  %v187_v54 = vand.u32 2147483647, %v183_v47  ;;  %v157_v31 = vsub.f32 %v1082_v1, %v1116_v53 }
 0x15b   :  { %v185_v46 = vsub.f32 %v1086_v6, %v1110_v52  ;;  %v219_v57 = vand.u32 2147483647, %v215_v12  ;;  %v217_v62 = vsub.f32 %v1125_v63, %v1113_v15  ;;  %v807_v52 = vpop.f32.mrf.mxu1 }
 0x15c   :  { %v191_v13 = vadd.f32 %v187_v54, %v159_v48  ;;  %v161_v14 = vand.u32 2147483647, %v157_v31 }
 0x15d   :  { %v189_v30 = vand.u32 2147483647, %v185_v46 }
 0x15e   :  { %v223_v4 = vadd.f32 %v219_v57, %v191_v13 }
 0x160   :  { %v876_v26 = vpop.eup %875 }
 0x169   :  { %v1244_v55 = vpop.f32.mrf.mxu0 }
 0x16b   :  { %v629_v9 = vpop.f32.mrf.mxu0 }
 0x18b   :  { %v449_v58 = vpop.permute.xlu1 %448  ;;  %v454_v60 = vpop.permute.xlu0 %453 }
 0x18c   :  { %v470_v50 = vadd.f32 %v1157_v43, %v449_v58  ;;  %v471_v3 = vadd.f32 %v1157_v43, %v454_v60 }
 0x18e   :  { %v1203_v17 = vsub.f32 %v470_v50, %v1195_v22  ;;  %v1206_v11 = vsub.f32 %v471_v3, %v1192_v59  ;;  %v220_v50 = vand.u32 2147483647, %v216_v2 }
 0x18f   :  { %v459_v24 = vpop.permute.xlu1 %458 }
 0x190   :  { %v514_v25 = vmax.f32 %v1203_v17, 1e-12  ;;  %v515_v29 = vmax.f32 %v1206_v11, 1e-12  ;;  %v472_v34 = vadd.f32 %v1157_v43, %v459_v24  ;;  %v229_v45 = vpop.permute.xlu0 %228  ;;  %v534_v58 = vsub.f32 %v1186_v51, %v1203_v17 }
 0x191   :  { %v247_v27 = vsub.f32 %v229_v45, %v1232_v42  ;;  %v535_v1 = vsub.f32 %v1183_v44, %v1206_v11  ;;  %v221_v51 = vand.u32 2147483647, %v217_v62 }
 0x192   :  { %879 = vrcp.f32 %v514_v25  ;;  %v1218_v37 = vsub.f32 %v472_v34, %v1212_v33  ;;  %v802_v34 = vpop.f32.mrf.mxu0 }
 0x193   :  { %881 = vrcp.f32 %v515_v29  ;;  %v464_v28 = vpop.permute.xlu1 %463  ;;  %v251_v6 = vand.u32 2147483647, %v247_v27  ;;  %v539_v44 = vmul.f32 %v876_v26, %v535_v1 }
 0x194   :  { %v473_v39 = vadd.f32 %v1157_v43, %v464_v28  ;;  %v516_v10 = vmax.f32 %v1218_v37, 1e-12  ;;  %883 = vrcp.f32 %v524_v35  ;;  %v156_v43 = vsub.f32 %v1080_v0, %v1116_v53  ;;  %v878_v53 = vpop.eup %877  ;;  %v241_v23 = vpop.permute.xlu0 %240 }
 0x195   :  { %v538_v24 = vmul.f32 %v878_v53, %v534_v58  ;;  %v536_v11 = vsub.f32 %v1200_v8, %v1218_v37  ;;  %v255_v20 = vadd.f32 %v251_v6, %v223_v4  ;;  %v250_v35 = vsub.f32 %v241_v23, %v1232_v42  ;;  %v731_v28 = vpop.f32.mrf.mxu1  ;;  %v632_v48 = vpop.f32.mrf.mxu0 }
 0x196   :  { %v1235_v7 = vsub.f32 %v473_v39, %v1222_v38  ;;  %885 = vrcp.f32 %v516_v10  ;;  %v160_v0 = vand.u32 2147483647, %v156_v43  ;;  %v193_v39 = vadd.f32 %v189_v30, %v161_v14 }
 0x197   :  { %887 = vrcp.f32 %v525_v41 }
 0x198   :  { %v517_v16 = vmax.f32 %v1235_v7, 1e-12  ;;  %v233_v49 = vpop.permute.xlu1 %232  ;;  %v192_v3 = vadd.f32 %v188_v19, %v160_v0  ;;  %v225_v43 = vadd.f32 %v221_v51, %v193_v39 }
 0x199   :  { %v248_v56 = vsub.f32 %v233_v49, %v1232_v42  ;;  %v810_v49 = vpop.f32.mrf.mxu1 }
 0x19a   :  { %889 = vrcp.f32 %v517_v16  ;;  %v224_v29 = vadd.f32 %v220_v50, %v192_v3 }
 0x19b   :  { %v252_v18 = vand.u32 2147483647, %v248_v56  ;;  %v741_v13 = vpop.f32.mrf.mxu1 }
 0x19c   :  { %v237_v60 = vpop.permute.xlu1 %236 }
 0x19d   :  { %v249_v15 = vsub.f32 %v237_v60, %v1232_v42  ;;  %v256_v40 = vadd.f32 %v252_v18, %v224_v29  ;;  %v254_v42 = vand.u32 2147483647, %v250_v35 }
 0x19f   :  { %v880_v32 = vpop.eup %879  ;;  %v253_v41 = vand.u32 2147483647, %v249_v15  ;;  %v258_v56 = vadd.f32 %v254_v42, %v1121_v61 }
 0x1a0   :  { %v882_v63 = vpop.eup %881  ;;  %v530_v17 = vmul.f32 %v880_v32, %v1195_v22 }
 0x1a1   :  { %v531_v25 = vmul.f32 %v882_v63, %v1192_v59  ;;  %v884_v5 = vpop.eup %883  ;;  %v537_v59 = vsub.f32 %v1210_v21, %v1235_v7  ;;  %v257_v19 = vadd.f32 %v253_v41, %v225_v43 }
 0x1a2   :  { %v542_v36 = vsub.f32 %v530_v17, %v538_v24  ;;  %v540_v37 = vmul.f32 %v884_v5, %v536_v11 }
 0x1a3   :  { %v543_v22 = vsub.f32 %v531_v25, %v539_v44  ;;  %v886_v10 = vpop.eup %885 }
 0x1a4   :  { %v644_v47 = vsub.f32 %v255_v20, %v542_v36  ;;  %v532_v8 = vmul.f32 %v886_v10, %v1212_v33  ;;  %v888_v12 = vpop.eup %887 }
 0x1a5   :  { %v645_v45 = vsub.f32 %v256_v40, %v543_v22  ;;  %v541_v31 = vmul.f32 %v888_v12, %v537_v59 }
 0x1a6   :  { %v648_v16 = vsub.f32 %v644_v47, %v629_v9  ;;  %v544_v27 = vsub.f32 %v532_v8, %v540_v37 }
 0x1a7   :  { %v890_v2 = vpop.eup %889  ;;  %v649_v54 = vsub.f32 %v645_v45, %v632_v48 }
 0x1a8   :  { %v533_v0 = vmul.f32 %v890_v2, %v1222_v38  ;;  %v732_v46 = vadd.f32 %v731_v28, %v648_v16  ;;  %v646_v7 = vsub.f32 %v257_v19, %v544_v27 }
 0x1a9   :  { %v737_v21 = vadd.f32 %v807_v52, %v649_v54 }
 0x1aa   :  { %v750_v33 = vadd.f32 0.5, %v732_v46  ;;  %v545_v57 = vsub.f32 %v533_v0, %v541_v31  ;;  %v650_v58 = vsub.f32 %v646_v7, %v1244_v55 }
 0x1ab   :  { %v751_v62 = vadd.f32 0.5, %v737_v21 }
 0x1ac   :  { %754 = vst [vmem:[#allocation2] sm:$0xff] %v750_v33  ;;  %v647_v60 = vsub.f32 %v258_v56, %v545_v57  ;;  %v742_v26 = vadd.f32 %v741_v13, %v650_v58 }
 0x1ad   :  { %755 = vst [vmem:[#allocation2 + $0x8] sm:$0xff] %v751_v62 }
 0x1ae   :  { %v651_v50 = vsub.f32 %v647_v60, %v802_v34  ;;  %v752_v3 = vadd.f32 0.5, %v742_v26 }
 0x1b0   :  { %v747_v38 = vadd.f32 %v810_v49, %v651_v50  ;;  %756 = vst [vmem:[#allocation2 + $0x10] sm:$0xff] %v752_v3 }
 0x1b2   :  { %v753_v1 = vadd.f32 0.5, %v747_v38 }
 0x1b4   :  { %757 = vst [vmem:[#allocation2 + $0x18] sm:$0xff] %v753_v1 }
 0x1b5   :  { %902 = shalt.err (!%p899_p4)
}
 0x1b6   :  { %s920_s28 = smov 128   ;;  %s921_s2 = smov 8  }
 0x1b7   :  { %769 = dma.vmem_to_hbm [thread:$0]  %s764_s26, 512, %s1279_s6, [#allocation3], %s920_s28, %s920_s28, %s921_s2  }
 0x1b8   :  { %911 = dma.done.wait [#allocation3], 512  }
 0x1b9   :  { %912 = vsyncadd [#allocation3], 4294966784 }
 0x1ba   :  { %773 = vsyncpa [#allocation3], 1 }

</bundles_post_ra>
